<compile_context>
chip_gen: v6e
topology: v6e:2x2x1
jax: 0.10.0
libtpu: 0.0.40
codegen_flags: <defaults>
</compile_context>

<pallas_src>
import jax
import jax.numpy as jnp
from jax import lax
from jax.experimental import pallas as pl
from jax.experimental.pallas import tpu as pltpu


# --------------------------------------------------------------------------
# Kernel: one batch tile (TB rows) per grid step; four dense matmuls total.
# --------------------------------------------------------------------------
def transfer_learning_kernel(x_ref, w1_ref, bb_ref, w2_ref, bc_ref,
                             wf1_ref, bf1_ref, wf2_ref, bf2_ref, out_ref):
    h1w = bb_ref.shape[1]          # p1u * 64  (pool1 slab width, 128-multiple)
    h2w = bc_ref.shape[1]          # l2 * 128  (pool2 slab width)

    # ---- conv1: one banded bf16 dot, all needed positions at once -----------
    # columns [0:h1w] = even conv1 positions, [h1w:2*h1w] = odd positions.
    pre1 = jnp.dot(x_ref[...], w1_ref[...],
                   preferred_element_type=jnp.float32)        # (TB, 2*h1w) f32
    # maxpool2(relu(conv+b)) == relu(max(even,odd)+b)  (monotone, bit-exact)
    pooled1 = jnp.maximum(
        jnp.maximum(pre1[:, :h1w], pre1[:, h1w:]) + bb_ref[...], 0.0)

    # Dropout(0.5) is identity at inference time (module.eval()).

    # ---- conv2: one banded bf16 dot over the contiguous pooled1 slab --------
    pre2 = jnp.dot(pooled1.astype(jnp.bfloat16), w2_ref[...],
                   preferred_element_type=jnp.float32)        # (TB, 2*h2w) f32
    pooled2 = jnp.maximum(
        jnp.maximum(pre2[:, :h2w], pre2[:, h2w:]) + bc_ref[...], 0.0)

    # ---- fc1 + ReLU: pooled2 slab is already in torch.flatten order ---------
    # (wf1 rows were pre-permuted to position-major / channel-minor).
    h1 = jnp.maximum(
        jnp.dot(pooled2.astype(jnp.bfloat16), wf1_ref[...],
                preferred_element_type=jnp.float32) + bf1_ref[...], 0.0)

    # ---- fc2 (lane-dense padded output; host slices back to num_classes) ----
    out_ref[...] = (jnp.dot(h1.astype(jnp.bfloat16), wf2_ref[...],
                            preferred_element_type=jnp.float32)
                    + bf2_ref[...])


# --------------------------------------------------------------------------
# Host wrapper: weight re-layouts (fold into XLA when jitted) + pallas_call.
# --------------------------------------------------------------------------
def transfer_learning_forward(x, params, block_b=256):
    (w_base, b_base, w_conv, b_conv, w_fc1, b_fc1, w_fc2, b_fc2) = params
    B, W, cin = x.shape
    c1, _, k = w_base.shape              # 64, 3, 3
    c2 = w_conv.shape[0]                 # 128
    nf1 = w_fc1.shape[0]                 # 100
    nc = w_fc2.shape[0]

    l1 = W - k + 1                       # conv1 length
    p1 = l1 // 2                         # pool1 length (PyTorch floors)
    l3 = p1 - k + 1                      # conv2 length
    l2 = l3 // 2                         # pool2 length
    assert w_fc1.shape[1] == c2 * l2, "flat_dim mismatch"

    # Only positions that actually reach the output (skip dead tails).
    n2 = 2 * l2                          # conv2 positions surviving pool2
    p1u = n2 + k - 1                     # pool1 positions feeding them (even!)
    f32 = jnp.float32
    bf16 = jnp.bfloat16

    # ---- banded conv1 weight: window extraction folded into the matmul ------
    # rows: w*cin + c_in of the lane-dense input; cols: (parity, pos, chan).
    wb_t = jnp.transpose(w_base, (2, 1, 0)).reshape(k * cin, c1)      # (9, 64)
    w1 = jnp.zeros((W * cin, 2 * p1u * c1), f32)
    for j in range(p1u):
        for par in range(2):             # 0 -> conv1 position 2j, 1 -> 2j+1
            pos = 2 * j + par
            col = (par * p1u + j) * c1
            w1 = w1.at[pos * cin:(pos + k) * cin, col:col + c1].set(wb_t)

    # ---- banded conv2 weight over the contiguous pooled1 slab ---------------
    wc_t = jnp.transpose(w_conv, (2, 1, 0)).reshape(k * c1, c2)       # (192,128)
    w2 = jnp.zeros((p1u * c1, 2 * l2 * c2), f32)
    for j in range(l2):
        for par in range(2):
            pos = 2 * j + par            # conv2 output position
            col = (par * l2 + j) * c2
            w2 = w2.at[pos * c1:(pos + k) * c1, col:col + c2].set(wc_t)

    # ---- fc weights: bake torch.flatten's channel-major order into wf1; -----
    # pad fc dims to lane-dense multiples of 128 (pads are zero -> exact).
    nf1_p = pl.cdiv(nf1, 128) * 128
    nc_p = pl.cdiv(nc, 128) * 128
    wf1_t = jnp.transpose(w_fc1.reshape(nf1, c2, l2), (2, 1, 0)).reshape(l2 * c2, nf1)
    wf1_p = jnp.zeros((l2 * c2, nf1_p), f32).at[:, :nf1].set(wf1_t)
    wf2_p = jnp.zeros((nf1_p, nc_p), f32).at[:nf1, :nc].set(w_fc2.T)

    # Biases stay f32 (VPU elementwise; v5e has no bf16 VPU), shaped (1, N).
    bb_t = jnp.tile(b_base, p1u)[None, :]                  # (1, p1u*64)
    bc_t = jnp.tile(b_conv, l2)[None, :]                   # (1, l2*128)
    bf1_p = jnp.zeros((1, nf1_p), f32).at[0, :nf1].set(b_fc1)
    bf2_p = jnp.zeros((1, nc_p), f32).at[0, :nc].set(b_fc2)

    # bf16 MXU operands (f32 accumulation preserved inside the kernel).
    x_flat = x.reshape(B, W * cin).astype(bf16)            # lane-dense (B, 48)
    w1 = w1.astype(bf16)
    w2 = w2.astype(bf16)
    wf1_p = wf1_p.astype(bf16)
    wf2_p = wf2_p.astype(bf16)

    # ---- batch tiling --------------------------------------------------------
    if B <= 8:
        tb, steps = B, 1                     # single tiny step
    elif B <= 2 * block_b:
        # >=2 grid steps so both v7x TensorCores get work; the extra ~0.35us
        # step is negligible on single-TC v5e/v6e.
        tb = ((B + 1) // 2 + 7) // 8 * 8
        steps = 2
    else:
        tb = block_b
        steps = pl.cdiv(B, tb)
    b_pad = steps * tb
    if b_pad != B:
        x_flat = jnp.pad(x_flat, ((0, b_pad - B), (0, 0)))

    out = pl.pallas_call(
        transfer_learning_kernel,
        out_shape=jax.ShapeDtypeStruct((b_pad, nc_p), f32),
        grid=(steps,),
        in_specs=[
            pl.BlockSpec((tb, W * cin), lambda b: (b, 0)),   # lane-dense input
            pl.BlockSpec(w1.shape, lambda b: (0, 0)),        # grid-invariant
            pl.BlockSpec(bb_t.shape, lambda b: (0, 0)),
            pl.BlockSpec(w2.shape, lambda b: (0, 0)),
            pl.BlockSpec(bc_t.shape, lambda b: (0, 0)),
            pl.BlockSpec(wf1_p.shape, lambda b: (0, 0)),
            pl.BlockSpec(bf1_p.shape, lambda b: (0, 0)),
            pl.BlockSpec(wf2_p.shape, lambda b: (0, 0)),
            pl.BlockSpec(bf2_p.shape, lambda b: (0, 0)),
        ],
        out_specs=pl.BlockSpec((tb, nc_p), lambda b: (b, 0)),
        compiler_params=pltpu.CompilerParams(
            dimension_semantics=("parallel",)),
    )(x_flat, w1, bb_t, w2, bc_t, wf1_p, bf1_p, wf2_p, bf2_p)
    return out[:B, :nc]


# --------------------------------------------------------------------------
# Deterministic parameter init (shapes from the module's __init__)
# --------------------------------------------------------------------------
def init_params(key, window_size, num_classes):
    l2 = ((window_size - 2) // 2 - 2) // 2
    flat_dim = 128 * l2
    ks = jax.random.split(key, 8)

    def rnd(k, shape, scale):
        return (scale * jax.random.normal(k, shape)).astype(jnp.float32)

    w_base = rnd(ks[0], (64, 3, 3), 0.2)
    b_base = rnd(ks[1], (64,), 0.1)
    w_conv = rnd(ks[2], (128, 64, 3), 0.05)
    b_conv = rnd(ks[3], (128,), 0.1)
    w_fc1 = rnd(ks[4], (100, flat_dim), 0.05)
    b_fc1 = rnd(ks[5], (100,), 0.1)
    w_fc2 = rnd(ks[6], (num_classes, 100), 0.1)
    b_fc2 = rnd(ks[7], (num_classes,), 0.1)
    return (w_base, b_base, w_conv, b_conv, w_fc1, b_fc1, w_fc2, b_fc2)


# --------------------------------------------------------------------------
# Pure-JAX reference (mirrors the PyTorch forward).  matmul_dtype=bf16 mirrors
# the kernel's bf16-operand / f32-accumulation matmuls for a tight comparison.
# --------------------------------------------------------------------------
def reference_forward(x, params, matmul_dtype=jnp.float32):
    (w_base, b_base, w_conv, b_conv, w_fc1, b_fc1, w_fc2, b_fc2) = params
    md = matmul_dtype
    xt = jnp.transpose(x, (0, 2, 1))                 # (B, 3, W), PyTorch NCL
    dn = ('NCH', 'OIH', 'NCH')

    def conv(h, w, b):
        y = lax.conv_general_dilated(h.astype(md), w.astype(md),
                                     window_strides=(1,), padding='VALID',
                                     dimension_numbers=dn,
                                     preferred_element_type=jnp.float32)
        return y + b[None, :, None]

    def pool(h):
        p = h.shape[2] // 2
        return jnp.maximum(h[:, :, 0:2 * p:2], h[:, :, 1:2 * p:2])

    h = jax.nn.relu(conv(xt, w_base, b_base))
    h = pool(h)
    h = jax.nn.relu(conv(h, w_conv, b_conv))
    h = pool(h)
    flat = h.reshape(h.shape[0], -1)                 # channel-major flatten
    h1 = jax.nn.relu(jnp.dot(flat.astype(md), w_fc1.T.astype(md),
                             preferred_element_type=jnp.float32) + b_fc1)
    return jnp.dot(h1.astype(md), w_fc2.T.astype(md),
                   preferred_element_type=jnp.float32) + b_fc2


if __name__ == "__main__":
    B, W, NC = 2, 16, 6            # batch=2, window_size=16, num_classes=6
    key = jax.random.PRNGKey(0)
    kx, kp = jax.random.split(key)
    x = jax.random.normal(kx, (B, W, 3), dtype=jnp.float32)
    params = init_params(kp, W, NC)

    fwd = jax.jit(transfer_learning_forward)   # folds host weight re-layouts
    out = fwd(x, params)
    jax.block_until_ready(out)

    ref = reference_forward(x, params, matmul_dtype=jnp.bfloat16)
    assert out.shape == (B, NC), (out.shape, (B, NC))
    assert jnp.allclose(out, ref, atol=1e-2, rtol=1e-2), (out, ref)
    print("KERNEL_OK")
</pallas_src>

<mosaic_0001>
module attributes {stable_mosaic.version = 11 : i64} {
  func.func @transfer_learning_kernel(%arg0: i32, %arg1: memref<2x48xbf16, #tpu.memory_space<vmem>>, %arg2: memref<48x768xbf16, #tpu.memory_space<vmem>>, %arg3: memref<1x384xf32, #tpu.memory_space<vmem>>, %arg4: memref<384x512xbf16, #tpu.memory_space<vmem>>, %arg5: memref<1x256xf32, #tpu.memory_space<vmem>>, %arg6: memref<256x128xbf16, #tpu.memory_space<vmem>>, %arg7: memref<1x128xf32, #tpu.memory_space<vmem>>, %arg8: memref<128x128xbf16, #tpu.memory_space<vmem>>, %arg9: memref<1x128xf32, #tpu.memory_space<vmem>>, %arg10: memref<2x128xf32, #tpu.memory_space<vmem>>) attributes {dimension_semantics = [#tpu.dimension_semantics<parallel>], iteration_bounds = array<i64: 1>, scalar_prefetch = 0 : i64, scratch_operands = 0 : i64, tpu.core_type = #tpu.core_type<tc>, window_params = [{transform_indices = @transform_0, window_bounds = array<i64: 2, 48>}, {pipeline_mode = #tpu.pipeline_mode<synchronous>, transform_indices = @transform_1, window_bounds = array<i64: 48, 768>}, {pipeline_mode = #tpu.pipeline_mode<synchronous>, transform_indices = @transform_2, window_bounds = array<i64: 1, 384>}, {pipeline_mode = #tpu.pipeline_mode<synchronous>, transform_indices = @transform_3, window_bounds = array<i64: 384, 512>}, {pipeline_mode = #tpu.pipeline_mode<synchronous>, transform_indices = @transform_4, window_bounds = array<i64: 1, 256>}, {pipeline_mode = #tpu.pipeline_mode<synchronous>, transform_indices = @transform_5, window_bounds = array<i64: 256, 128>}, {pipeline_mode = #tpu.pipeline_mode<synchronous>, transform_indices = @transform_6, window_bounds = array<i64: 1, 128>}, {pipeline_mode = #tpu.pipeline_mode<synchronous>, transform_indices = @transform_7, window_bounds = array<i64: 128, 128>}, {pipeline_mode = #tpu.pipeline_mode<synchronous>, transform_indices = @transform_8, window_bounds = array<i64: 1, 128>}, {transform_indices = @transform_9, window_bounds = array<i64: 2, 128>}]} {
    %c0 = arith.constant 0 : index
    %c0_0 = arith.constant 0 : index
    %0 = vector.load %arg1[%c0, %c0_0] : memref<2x48xbf16, #tpu.memory_space<vmem>>, vector<2x48xbf16>
    %c0_1 = arith.constant 0 : index
    %c0_2 = arith.constant 0 : index
    %1 = vector.load %arg2[%c0_1, %c0_2] : memref<48x768xbf16, #tpu.memory_space<vmem>>, vector<48x768xbf16>
    %cst = arith.constant dense<0.000000e+00> : vector<2x768xf32>
    %2 = tpu.matmul %0, %1, %cst {dimension_numbers = #tpu.dot_dimension_numbers<[1], [0], [0], [1], [0, 0, 1, 1], [], []>} : vector<2x48xbf16>, vector<48x768xbf16>, vector<2x768xf32> -> vector<2x768xf32>
    %3 = vector.extract_strided_slice %2 {offsets = [0, 0], sizes = [2, 384], strides = [1, 1]} : vector<2x768xf32> to vector<2x384xf32>
    %4 = vector.extract_strided_slice %2 {offsets = [0, 384], sizes = [2, 384], strides = [1, 1]} : vector<2x768xf32> to vector<2x384xf32>
    %5 = arith.maximumf %3, %4 : vector<2x384xf32>
    %c0_3 = arith.constant 0 : index
    %c0_4 = arith.constant 0 : index
    %6 = vector.load %arg3[%c0_3, %c0_4] : memref<1x384xf32, #tpu.memory_space<vmem>>, vector<1x384xf32>
    %7 = vector.broadcast %6 : vector<1x384xf32> to vector<2x384xf32>
    %8 = arith.addf %5, %7 : vector<2x384xf32>
    %cst_5 = arith.constant 0.000000e+00 : f32
    %9 = vector.broadcast %cst_5 : f32 to vector<2x384xf32>
    %10 = arith.maximumf %8, %9 : vector<2x384xf32>
    %11 = arith.truncf %10 : vector<2x384xf32> to vector<2x384xbf16>
    %c0_6 = arith.constant 0 : index
    %c0_7 = arith.constant 0 : index
    %12 = vector.load %arg4[%c0_6, %c0_7] : memref<384x512xbf16, #tpu.memory_space<vmem>>, vector<384x512xbf16>
    %cst_8 = arith.constant dense<0.000000e+00> : vector<2x512xf32>
    %13 = tpu.matmul %11, %12, %cst_8 {dimension_numbers = #tpu.dot_dimension_numbers<[1], [0], [0], [1], [0, 0, 1, 1], [], []>} : vector<2x384xbf16>, vector<384x512xbf16>, vector<2x512xf32> -> vector<2x512xf32>
    %14 = vector.extract_strided_slice %13 {offsets = [0, 0], sizes = [2, 256], strides = [1, 1]} : vector<2x512xf32> to vector<2x256xf32>
    %15 = vector.extract_strided_slice %13 {offsets = [0, 256], sizes = [2, 256], strides = [1, 1]} : vector<2x512xf32> to vector<2x256xf32>
    %16 = arith.maximumf %14, %15 : vector<2x256xf32>
    %c0_9 = arith.constant 0 : index
    %c0_10 = arith.constant 0 : index
    %17 = vector.load %arg5[%c0_9, %c0_10] : memref<1x256xf32, #tpu.memory_space<vmem>>, vector<1x256xf32>
    %18 = vector.broadcast %17 : vector<1x256xf32> to vector<2x256xf32>
    %19 = arith.addf %16, %18 : vector<2x256xf32>
    %cst_11 = arith.constant 0.000000e+00 : f32
    %20 = vector.broadcast %cst_11 : f32 to vector<2x256xf32>
    %21 = arith.maximumf %19, %20 : vector<2x256xf32>
    %22 = arith.truncf %21 : vector<2x256xf32> to vector<2x256xbf16>
    %c0_12 = arith.constant 0 : index
    %c0_13 = arith.constant 0 : index
    %23 = vector.load %arg6[%c0_12, %c0_13] : memref<256x128xbf16, #tpu.memory_space<vmem>>, vector<256x128xbf16>
    %cst_14 = arith.constant dense<0.000000e+00> : vector<2x128xf32>
    %24 = tpu.matmul %22, %23, %cst_14 {dimension_numbers = #tpu.dot_dimension_numbers<[1], [0], [0], [1], [0, 0, 1, 1], [], []>} : vector<2x256xbf16>, vector<256x128xbf16>, vector<2x128xf32> -> vector<2x128xf32>
    %c0_15 = arith.constant 0 : index
    %c0_16 = arith.constant 0 : index
    %25 = vector.load %arg7[%c0_15, %c0_16] : memref<1x128xf32, #tpu.memory_space<vmem>>, vector<1x128xf32>
    %26 = vector.broadcast %25 : vector<1x128xf32> to vector<2x128xf32>
    %27 = arith.addf %24, %26 : vector<2x128xf32>
    %cst_17 = arith.constant 0.000000e+00 : f32
    %28 = vector.broadcast %cst_17 : f32 to vector<2x128xf32>
    %29 = arith.maximumf %27, %28 : vector<2x128xf32>
    %30 = arith.truncf %29 : vector<2x128xf32> to vector<2x128xbf16>
    %c0_18 = arith.constant 0 : index
    %c0_19 = arith.constant 0 : index
    %31 = vector.load %arg8[%c0_18, %c0_19] : memref<128x128xbf16, #tpu.memory_space<vmem>>, vector<128x128xbf16>
    %cst_20 = arith.constant dense<0.000000e+00> : vector<2x128xf32>
    %32 = tpu.matmul %30, %31, %cst_20 {dimension_numbers = #tpu.dot_dimension_numbers<[1], [0], [0], [1], [0, 0, 1, 1], [], []>} : vector<2x128xbf16>, vector<128x128xbf16>, vector<2x128xf32> -> vector<2x128xf32>
    %c0_21 = arith.constant 0 : index
    %c0_22 = arith.constant 0 : index
    %33 = vector.load %arg9[%c0_21, %c0_22] : memref<1x128xf32, #tpu.memory_space<vmem>>, vector<1x128xf32>
    %34 = vector.broadcast %33 : vector<1x128xf32> to vector<2x128xf32>
    %35 = arith.addf %32, %34 : vector<2x128xf32>
    %c0_23 = arith.constant 0 : index
    %c0_24 = arith.constant 0 : index
    %36 = vector.load %arg10[%c0_23, %c0_24] : memref<2x128xf32, #tpu.memory_space<vmem>>, vector<2x128xf32>
    tpu.vector_store %arg10[%c0_23, %c0_24], %35 {strides = array<i32>} : memref<2x128xf32, #tpu.memory_space<vmem>>, vector<2x128xf32>,
    return
  }
  func.func @transform_0(%arg0: i32) -> (i32, i32) {
    %c0_i32 = arith.constant 0 : i32
    %c0_i32_0 = arith.constant 0 : i32
    return %arg0, %c0_i32 : i32, i32
  }
  func.func @transform_1(%arg0: i32) -> (i32, i32) {
    %c0_i32 = arith.constant 0 : i32
    %c0_i32_0 = arith.constant 0 : i32
    %c0_i32_1 = arith.constant 0 : i32
    return %c0_i32, %c0_i32_0 : i32, i32
  }
  func.func @transform_2(%arg0: i32) -> (i32, i32) {
    %c0_i32 = arith.constant 0 : i32
    %c0_i32_0 = arith.constant 0 : i32
    %c0_i32_1 = arith.constant 0 : i32
    return %c0_i32, %c0_i32_0 : i32, i32
  }
  func.func @transform_3(%arg0: i32) -> (i32, i32) {
    %c0_i32 = arith.constant 0 : i32
    %c0_i32_0 = arith.constant 0 : i32
    %c0_i32_1 = arith.constant 0 : i32
    return %c0_i32, %c0_i32_0 : i32, i32
  }
  func.func @transform_4(%arg0: i32) -> (i32, i32) {
    %c0_i32 = arith.constant 0 : i32
    %c0_i32_0 = arith.constant 0 : i32
    %c0_i32_1 = arith.constant 0 : i32
    return %c0_i32, %c0_i32_0 : i32, i32
  }
  func.func @transform_5(%arg0: i32) -> (i32, i32) {
    %c0_i32 = arith.constant 0 : i32
    %c0_i32_0 = arith.constant 0 : i32
    %c0_i32_1 = arith.constant 0 : i32
    return %c0_i32, %c0_i32_0 : i32, i32
  }
  func.func @transform_6(%arg0: i32) -> (i32, i32) {
    %c0_i32 = arith.constant 0 : i32
    %c0_i32_0 = arith.constant 0 : i32
    %c0_i32_1 = arith.constant 0 : i32
    return %c0_i32, %c0_i32_0 : i32, i32
  }
  func.func @transform_7(%arg0: i32) -> (i32, i32) {
    %c0_i32 = arith.constant 0 : i32
    %c0_i32_0 = arith.constant 0 : i32
    %c0_i32_1 = arith.constant 0 : i32
    return %c0_i32, %c0_i32_0 : i32, i32
  }
  func.func @transform_8(%arg0: i32) -> (i32, i32) {
    %c0_i32 = arith.constant 0 : i32
    %c0_i32_0 = arith.constant 0 : i32
    %c0_i32_1 = arith.constant 0 : i32
    return %c0_i32, %c0_i32_0 : i32, i32
  }
  func.func @transform_9(%arg0: i32) -> (i32, i32) {
    %c0_i32 = arith.constant 0 : i32
    %c0_i32_0 = arith.constant 0 : i32
    return %arg0, %c0_i32 : i32, i32
  }
}

</mosaic_0001>

<bundles_post_ra>
// kernel: tile.14
= control target key start
LH: loop header
LB: loop body
LE: loop exit
PB: predicated region body
PF: predicated region fallthrough
CT: control target
= control target key end

     0   :  { %vm3_vm0 = vcmask 523264   ;;  %s37_s8 = smov 64   ;;  %vm9_vm1 = vcmask 1048064   ;;  %s63_s0 = inlined_call_operand.vmem [shape: f32[6,64], index: 0, kind: input, shape index: {}]   ;;  %s64_s1 = inlined_call_operand.vmem [shape: f32[1,384], index: 1, kind: output, shape index: {}]  }
   0x1   :  { %v33_v0 = vld [vmem:[%s63_s0 + $0x1] ss:$2 sm:$0x7]   ;;  %v2_v1 = vld [vmem:[%s63_s0] ss:$2 sm:$0x7]  }
   0x2   :  { %7 = vrot.lane.b32.xlu0 %v33_v0, %s37_s8  ;;  %4 = vst.msk [vmem:[#allocation0] ss:$8 sm:$0x7] %vm3_vm0, %v2_v1  }
  0x74   :  { %v8_v2 = vpop.permute.xlu0 %7  }
  0x75   :  { %10 = vst.msk [vmem:[#allocation0] ss:$8 sm:$0x7] %vm9_vm1, %v8_v2  }
  0x7c   :  { %v15_v3 = vld [vmem:[#allocation0] sm:$0x1]  ;;  %v20_v4 = vld [vmem:[#allocation0 + $0x8] sm:$0x1]  ;;  %v26_v5 = vld [vmem:[#allocation0 + $0x10] sm:$0x1] }
  0x7d   :  { %18 = vst [vmem:[%s64_s1] sm:$0x1] %v15_v3  ;;  %34 = vst [vmem:[%s64_s1 + $0x1] sm:$0x1] %v20_v4 }
  0x7e   :  { %35 = vst [vmem:[%s64_s1 + $0x2] sm:$0x1] %v26_v5 }

// kernel: tile.13
= control target key start
LH: loop header
LB: loop body
LE: loop exit
PB: predicated region body
PF: predicated region fallthrough
CT: control target
= control target key end

     0   :  { %s22_s0 = inlined_call_operand.vmem [shape: f32[64], index: 0, kind: input, shape index: {}]   ;;  %s23_s1 = inlined_call_operand.vmem [shape: f32[6,64], index: 1, kind: output, shape index: {}]  }
   0x1   :  { %v4_v0 = vld [vmem:[%s22_s0] ss:$0 sm:$0xff] }
   0x2   :  { %5 = vst [vmem:[%s23_s1] sm:$0xff] %v4_v0 }

// kernel: tile.18
= control target key start
LH: loop header
LB: loop body
LE: loop exit
PB: predicated region body
PF: predicated region fallthrough
CT: control target
= control target key end

     0   :  { %s22_s0 = inlined_call_operand.vmem [shape: f32[128], index: 0, kind: input, shape index: {}]   ;;  %s23_s1 = inlined_call_operand.vmem [shape: f32[2,128], index: 1, kind: output, shape index: {}]  }
   0x1   :  { %v4_v0 = vld [vmem:[%s22_s0] ss:$0 sm:$0xff] }
   0x2   :  { %5 = vst [vmem:[%s23_s1] sm:$0x3] %v4_v0 }

// kernel: transfer_learning_forward.1
= control target key start
LH: loop header
LB: loop body
LE: loop exit
PB: predicated region body
PF: predicated region fallthrough
CT: control target
= control target key end

     0   :  { %v1777_v2 = vmov 0   ;;  %vm143_vm0 = vcmask 392192   ;;  %s2292_s0 = inlined_call_operand.vmem [shape: bf16[2,48], index: 0, kind: input, shape index: {}]   ;;  %s2293_s1 = inlined_call_operand.vmem [shape: bf16[48,768], index: 1, kind: input, shape index: {}]   ;;  %s2294_s2 = inlined_call_operand.vmem [shape: f32[1,384], index: 2, kind: input, shape index: {}]   ;;  %s2295_s3 = inlined_call_operand.vmem [shape: bf16[384,512], index: 3, kind: input, shape index: {}]   ;;  %s2296_s4 = inlined_call_operand.vmem [shape: f32[1,256], index: 4, kind: input, shape index: {}]   ;;  %s2297_s5 = inlined_call_operand.vmem [shape: bf16[256,128], index: 5, kind: input, shape index: {}]   ;;  %s2298_s6 = inlined_call_operand.vmem [shape: f32[1,128], index: 6, kind: input, shape index: {}]   ;;  %s2299_s7 = inlined_call_operand.vmem [shape: bf16[128,128], index: 7, kind: input, shape index: {}]   ;;  %s2300_s8 = inlined_call_operand.vmem [shape: f32[1,128], index: 8, kind: input, shape index: {}]   ;;  %s2301_s9 = inlined_call_operand.hbm [shape: f32[2,128], index: 9, kind: output, shape index: {}]  }
   0x1   :  { %v1560_v0 = vld [vmem:[%s2293_s1 + $0x64] ss:$24 sps:$4 sm:$0xff]   ;;  %179 = vmatprep.mubr.bf16.mxu0 %v1777_v2  ;;  %220 = vmatprep.mubr.bf16.mxu1 %v1777_v2  ;;  %v1564_v3 = vld [vmem:[%s2293_s1 + $0x60] ss:$24 sps:$4 sm:$0xff]   ;;  %v1566_v5 = vld [vmem:[%s2293_s1 + $0x34] ss:$24 sps:$4 sm:$0xff]  }
   0x2   :  { %v1562_v1 = vld [vmem:[%s2293_s1 + $0x6c] ss:$24 sps:$4 sm:$0xff]   ;;  %157 = vmatprep.subr.bf16.mxu0 %v1560_v0  ;;  %v1565_v4 = vld [vmem:[%s2293_s1 + $0x68] ss:$24 sps:$4 sm:$0xff]   ;;  %v1568_v6 = vld [vmem:[%s2293_s1 + $0x3c] ss:$24 sps:$4 sm:$0xff]  }
   0x3   :  { %198 = vmatprep.subr.bf16.mxu1 %v1562_v1  ;;  %158 = vmatpush1.bf16.msra.mxu0 %v1564_v3  ;;  %v1570_v7 = vld [vmem:[%s2293_s1 + $0x30] ss:$24 sps:$4 sm:$0xff]   ;;  %v1572_v9 = vld [vmem:[%s2293_s1 + $0x4] ss:$24 sps:$4 sm:$0xff]   ;;  %v1576_v11 = vld [vmem:[%s2293_s1] ss:$24 sps:$4 sm:$0xff]  }
   0x4   :  { %199 = vmatpush1.bf16.msra.mxu1 %v1565_v4  ;;  %159 = vmatprep.subr.bf16.mxu0 %v1566_v5  ;;  %v1571_v8 = vld [vmem:[%s2293_s1 + $0x38] ss:$24 sps:$4 sm:$0xff]   ;;  %v1574_v10 = vld [vmem:[%s2293_s1 + $0xc] ss:$24 sps:$4 sm:$0xff]   ;;  %v1577_v12 = vld [vmem:[%s2293_s1 + $0x8] ss:$24 sps:$4 sm:$0xff]  }
   0x5   :  { %200 = vmatprep.subr.bf16.mxu1 %v1568_v6  ;;  %v1580_v13 = vld [vmem:[%s2293_s1 + $0x74] ss:$24 sps:$4 sm:$0xff]   ;;  %v34_v14 = vld [vmem:[%s2292_s0] sm:$0x1]  ;;  %v1578_v15 = vld [vmem:[%s2293_s1 + $0x70] ss:$24 sps:$4 sm:$0xff]  }
   0x6   :  { %v1583_v16 = vld [vmem:[%s2293_s1 + $0x44] ss:$24 sps:$4 sm:$0xff]   ;;  %v1587_v18 = vld [vmem:[%s2295_s3 + $0xe0] ss:$16 sps:$4 sm:$0xff]   ;;  %v1586_v21 = vld [vmem:[%s2293_s1 + $0x14] ss:$24 sps:$4 sm:$0xff]  }
   0x7   :  { %160 = vmatpush1.bf16.msra.mxu0 %v1570_v7  ;;  %v1589_v17 = vld [vmem:[%s2295_s3 + $0xe4] ss:$16 sps:$4 sm:$0xff]   ;;  %v1581_v20 = vld [vmem:[%s2293_s1 + $0x40] ss:$24 sps:$4 sm:$0xff]   ;;  %v1584_v24 = vld [vmem:[%s2293_s1 + $0x10] ss:$24 sps:$4 sm:$0xff]  }
   0x8   :  { %201 = vmatpush1.bf16.msra.mxu1 %v1571_v8  ;;  %161 = vmatprep.subr.bf16.mxu0 %v1572_v9  ;;  %v1592_v19 = vld [vmem:[%s2295_s3 + $0xc4] ss:$16 sps:$4 sm:$0xff]   ;;  %v1590_v22 = vld [vmem:[%s2295_s3 + $0xc0] ss:$16 sps:$4 sm:$0xff]  }
   0x9   :  { %202 = vmatprep.subr.bf16.mxu1 %v1574_v10  ;;  %v1595_v23 = vld [vmem:[%s2295_s3 + $0xa4] ss:$16 sps:$4 sm:$0xff]   ;;  %v1593_v25 = vld [vmem:[%s2295_s3 + $0xa0] ss:$16 sps:$4 sm:$0xff]  }
   0xa   :  { %v1598_v26 = vld [vmem:[%s2295_s3 + $0x84] ss:$16 sps:$4 sm:$0xff]   ;;  %v1614_v27 = vld [vmem:[%s2295_s3 + $0x2e0] ss:$16 sps:$4 sm:$0xff]  }
   0xb   :  { %162 = vmatpush1.bf16.msra.mxu0 %v1576_v11  ;;  %v1616_v28 = vld [vmem:[%s2295_s3 + $0x2e4] ss:$16 sps:$4 sm:$0xff]   ;;  %v1596_v29 = vld [vmem:[%s2295_s3 + $0x80] ss:$16 sps:$4 sm:$0xff]  }
   0xc   :  { %203 = vmatpush1.bf16.msra.mxu1 %v1577_v12  ;;  %239 = vmatprep.subr.bf16.mxu0 %v1580_v13  ;;  %v1601_v30 = vld [vmem:[%s2295_s3 + $0x64] ss:$16 sps:$4 sm:$0xff]   ;;  %v1599_v32 = vld [vmem:[%s2295_s3 + $0x60] ss:$16 sps:$4 sm:$0xff]  }
   0xd   :  { %875 = vmatprep.subr.bf16.mxu1 %v1589_v17  ;;  %v1622_v31 = vld [vmem:[%s2295_s3 + $0x2c4] ss:$16 sps:$4 sm:$0xff]   ;;  %v1620_v33 = vld [vmem:[%s2295_s3 + $0x2c0] ss:$16 sps:$4 sm:$0xff]  }
   0xe   :  { %1380 = vmatmul.mubr.msk.bf16.vlgmr.msra.gmra.mxu0 %vm143_vm0, %v34_v14  ;;  %v1604_v34 = vld [vmem:[%s2295_s3 + $0x44] ss:$16 sps:$4 sm:$0xff]   ;;  %v1626_v36 = vld [vmem:[%s2295_s3 + $0x2a0] ss:$16 sps:$4 sm:$0xff]  }
   0xf   :  { %1381 = vmatmul.mubr.msk.bf16.vlgmr.msra.gmra.mxu1 %vm143_vm0, %v34_v14  ;;  %240 = vmatpush1.bf16.msra.mxu0 %v1578_v15  ;;  %v1628_v35 = vld [vmem:[%s2295_s3 + $0x2a4] ss:$16 sps:$4 sm:$0xff]   ;;  %v1602_v37 = vld [vmem:[%s2295_s3 + $0x40] ss:$16 sps:$4 sm:$0xff]  }
  0x10   :  { %261 = vmatprep.mubr.bf16.mxu0 %v1777_v2  ;;  %241 = vmatprep.subr.bf16.mxu0 %v1583_v16  ;;  %v1607_v38 = vld [vmem:[%s2295_s3 + $0x24] ss:$16 sps:$4 sm:$0xff]   ;;  %v1605_v39 = vld [vmem:[%s2295_s3 + $0x20] ss:$16 sps:$4 sm:$0xff]  }
  0x11   :  { %876 = vmatpush1.bf16.msra.mxu1 %v1587_v18  ;;  %v1610_v40 = vld [vmem:[%s2295_s3 + $0x4] ss:$16 sps:$4 sm:$0xff]   ;;  %v1608_v41 = vld [vmem:[%s2295_s3] ss:$16 sps:$4 sm:$0xff]  }
  0x12   :  { %877 = vmatprep.subr.bf16.mxu1 %v1592_v19  ;;  %v1613_v42 = vld [vmem:[%s2295_s3 + $0x1e4] ss:$16 sps:$4 sm:$0xff]   ;;  %v1611_v43 = vld [vmem:[%s2295_s3 + $0x1e0] ss:$16 sps:$4 sm:$0xff]  }
  0x13   :  { %242 = vmatpush1.bf16.msra.mxu0 %v1581_v20  ;;  %v1619_v44 = vld [vmem:[%s2295_s3 + $0x1c4] ss:$16 sps:$4 sm:$0xff]   ;;  %v1617_v45 = vld [vmem:[%s2295_s3 + $0x1c0] ss:$16 sps:$4 sm:$0xff]  }
  0x14   :  { %243 = vmatprep.subr.bf16.mxu0 %v1586_v21  ;;  %v1625_v46 = vld [vmem:[%s2295_s3 + $0x1a4] ss:$16 sps:$4 sm:$0xff]   ;;  %v1623_v47 = vld [vmem:[%s2295_s3 + $0x1a0] ss:$16 sps:$4 sm:$0xff]  }
  0x15   :  { %878 = vmatpush1.bf16.msra.mxu1 %v1590_v22 }
  0x16   :  { %879 = vmatprep.subr.bf16.mxu1 %v1595_v23 }
  0x17   :  { %244 = vmatpush1.bf16.msra.mxu0 %v1584_v24 }
  0x18   :  { %916 = vmatprep.subr.bf16.mxu0 %v1616_v28 }
  0x19   :  { %880 = vmatpush1.bf16.msra.mxu1 %v1593_v25 }
  0x1a   :  { %1382 = vmatmul.mubr.msk.bf16.vlgmr.msra.gmra.mxu0 %vm143_vm0, %v34_v14  ;;  %881 = vmatprep.subr.bf16.mxu1 %v1598_v26 }
  0x1b   :  { %948 = vmatprep.mubr.bf16.mxu0 %v1777_v2  ;;  %917 = vmatpush1.bf16.msra.mxu0 %v1614_v27 }
  0x1c   :  { %918 = vmatprep.subr.bf16.mxu0 %v1622_v31 }
  0x1d   :  { %882 = vmatpush1.bf16.msra.mxu1 %v1596_v29 }
  0x1e   :  { %883 = vmatprep.subr.bf16.mxu1 %v1601_v30 }
  0x1f   :  { %919 = vmatpush1.bf16.msra.mxu0 %v1620_v33 }
  0x20   :  { %920 = vmatprep.subr.bf16.mxu0 %v1628_v35 }
  0x21   :  { %884 = vmatpush1.bf16.msra.mxu1 %v1599_v32 }
  0x22   :  { %885 = vmatprep.subr.bf16.mxu1 %v1604_v34 }
  0x23   :  { %921 = vmatpush1.bf16.msra.mxu0 %v1626_v36 }
  0x25   :  { %886 = vmatpush1.bf16.msra.mxu1 %v1602_v37 }
  0x26   :  { %887 = vmatprep.subr.bf16.mxu1 %v1607_v38 }
  0x29   :  { %888 = vmatpush1.bf16.msra.mxu1 %v1605_v39 }
  0x2a   :  { %889 = vmatprep.subr.bf16.mxu1 %v1610_v40 }
  0x2d   :  { %890 = vmatpush1.bf16.msra.mxu1 %v1608_v41 }
  0x2e   :  { %891 = vmatprep.subr.bf16.mxu1 %v1613_v42 }
  0x31   :  { %892 = vmatpush2.bf16.msra.mxu1 %v1611_v43 }
  0x32   :  { %893 = vmatprep.subr.bf16.mxu1 %v1619_v44 }
  0x35   :  { %894 = vmatpush2.bf16.msra.mxu1 %v1617_v45 }
  0x36   :  { %895 = vmatprep.subr.bf16.mxu1 %v1625_v46 }
  0x39   :  { %896 = vmatpush2.bf16.msra.mxu1 %v1623_v47 }
  0x3a   :  { %14 = vsyncpa [#allocation3], 0  ;;  %v1631_v48 = vld [vmem:[%s2295_s3 + $0x184] ss:$16 sps:$4 sm:$0xff]   ;;  %v1629_v49 = vld [vmem:[%s2295_s3 + $0x180] ss:$16 sps:$4 sm:$0xff]   ;;  %v275_v7 = vlaneseq }
  0x3b   :  { %v1634_v50 = vld [vmem:[%s2295_s3 + $0x284] ss:$16 sps:$4 sm:$0xff]   ;;  %897 = vmatprep.subr.bf16.mxu1 %v1631_v48  ;;  %v1632_v51 = vld [vmem:[%s2295_s3 + $0x280] ss:$16 sps:$4 sm:$0xff]   ;;  %v1661_v5 = vld [vmem:[%s2295_s3 + $0x2ec] ss:$16 sps:$4 sm:$0xff]  }
  0x3c   :  { %922 = vmatprep.subr.bf16.mxu0 %v1634_v50  ;;  %v1637_v52 = vld [vmem:[%s2295_s3 + $0x164] ss:$16 sps:$4 sm:$0xff]   ;;  %v1635_v53 = vld [vmem:[%s2295_s3 + $0x160] ss:$16 sps:$4 sm:$0xff]   ;;  %v1664_v6 = vld [vmem:[%s2295_s3 + $0xec] ss:$16 sps:$4 sm:$0xff]  }
  0x3d   :  { %898 = vmatpush2.bf16.msra.mxu1 %v1629_v49  ;;  %923 = vmatpush1.bf16.msra.mxu0 %v1632_v51  ;;  %v1640_v54 = vld [vmem:[%s2295_s3 + $0x264] ss:$16 sps:$4 sm:$0xff]   ;;  %v1638_v55 = vld [vmem:[%s2295_s3 + $0x260] ss:$16 sps:$4 sm:$0xff]   ;;  %v2045_v10 = vshrl.u32 %v275_v7, 7  ;;  %vm1779_vm1 = vmmov 0  }
  0x3e   :  { %899 = vmatprep.subr.bf16.mxu1 %v1637_v52  ;;  %924 = vmatprep.subr.bf16.mxu0 %v1640_v54  ;;  %v1643_v56 = vld [vmem:[%s2295_s3 + $0x144] ss:$16 sps:$4 sm:$0xff]   ;;  %v1641_v57 = vld [vmem:[%s2295_s3 + $0x140] ss:$16 sps:$4 sm:$0xff]   ;;  %v1659_v38 = vld [vmem:[%s2295_s3 + $0x2e8] ss:$16 sps:$4 sm:$0xff]  }
  0x3f   :  { %v1646_v58 = vld [vmem:[%s2295_s3 + $0x244] ss:$16 sps:$4 sm:$0xff]   ;;  %v1644_v59 = vld [vmem:[%s2295_s3 + $0x240] ss:$16 sps:$4 sm:$0xff]   ;;  %v277_v13 = vsub.s32 0, %v2045_v10  ;;  %v281_v19 = vsub.s32 1, %v2045_v10 }
  0x40   :  { %v1649_v60 = vld [vmem:[%s2295_s3 + $0x124] ss:$16 sps:$4 sm:$0xff]   ;;  %v1647_v61 = vld [vmem:[%s2295_s3 + $0x120] ss:$16 sps:$4 sm:$0xff]   ;;  %v285_v22 = vsub.s32 2, %v2045_v10  ;;  %v1753_v10 = vld [vmem:[%s2299_s7 + $0x8] sm:$0xff]  }
  0x41   :  { %900 = vmatpush2.bf16.msra.mxu1 %v1635_v53  ;;  %925 = vmatpush1.bf16.msra.mxu0 %v1638_v55  ;;  %v1652_v62 = vld [vmem:[%s2295_s3 + $0x224] ss:$16 sps:$4 sm:$0xff]   ;;  %v1650_v63 = vld [vmem:[%s2295_s3 + $0x220] ss:$16 sps:$4 sm:$0xff]   ;;  %v1662_v40 = vld [vmem:[%s2295_s3 + $0xe8] ss:$16 sps:$4 sm:$0xff]  }
  0x42   :  { %901 = vmatprep.subr.bf16.mxu1 %v1643_v56  ;;  %926 = vmatprep.subr.bf16.mxu0 %v1646_v58  ;;  %v1655_v0 = vld [vmem:[%s2295_s3 + $0x104] ss:$16 sps:$4 sm:$0xff]   ;;  %v1653_v1 = vld [vmem:[%s2295_s3 + $0x100] ss:$16 sps:$4 sm:$0xff]   ;;  %v1667_v42 = vld [vmem:[%s2295_s3 + $0x2cc] ss:$16 sps:$4 sm:$0xff]  }
  0x43   :  { %v1658_v3 = vld [vmem:[%s2295_s3 + $0x204] ss:$16 sps:$4 sm:$0xff]   ;;  %v1656_v4 = vld [vmem:[%s2295_s3 + $0x200] ss:$16 sps:$4 sm:$0xff]   ;;  %v1670_v43 = vld [vmem:[%s2295_s3 + $0xcc] ss:$16 sps:$4 sm:$0xff]  }
  0x44   :  { %v273_v16 = vld [vmem:[%s2294_s2] sm:$0x7]  ;;  %v1665_v44 = vld [vmem:[%s2295_s3 + $0x2c8] ss:$16 sps:$4 sm:$0xff]   ;;  %v1673_v46 = vld [vmem:[%s2295_s3 + $0x2ac] ss:$16 sps:$4 sm:$0xff]  }
  0x45   :  { %902 = vmatpush2.bf16.msra.mxu1 %v1641_v57  ;;  %927 = vmatpush1.bf16.msra.mxu0 %v1644_v59  ;;  %v278_v21 = vrot.slane %v273_v16, %v277_v13  ;;  %v282_v23 = vrot.slane %v273_v16, %v281_v19  ;;  %v286_v27 = vrot.slane %v273_v16, %v285_v22  ;;  %v1668_v45 = vld [vmem:[%s2295_s3 + $0xc8] ss:$16 sps:$4 sm:$0xff]   ;;  %v1676_v47 = vld [vmem:[%s2295_s3 + $0xac] ss:$16 sps:$4 sm:$0xff]  }
  0x46   :  { %903 = vmatprep.subr.bf16.mxu1 %v1649_v60  ;;  %928 = vmatprep.subr.bf16.mxu0 %v1652_v62  ;;  %v1671_v48 = vld [vmem:[%s2295_s3 + $0x2a8] ss:$16 sps:$4 sm:$0xff]   ;;  %v1679_v50 = vld [vmem:[%s2295_s3 + $0x28c] ss:$16 sps:$4 sm:$0xff]  }
  0x47   :  { %v1674_v49 = vld [vmem:[%s2295_s3 + $0xa8] ss:$16 sps:$4 sm:$0xff]   ;;  %v1685_v53 = vld [vmem:[%s2295_s3 + $0x26c] ss:$16 sps:$4 sm:$0xff]  }
  0x48   :  { %v1677_v51 = vld [vmem:[%s2295_s3 + $0x288] ss:$16 sps:$4 sm:$0xff]   ;;  %v1688_v54 = vld [vmem:[%s2295_s3 + $0x6c] ss:$16 sps:$4 sm:$0xff]  }
  0x49   :  { %904 = vmatpush2.bf16.msra.mxu1 %v1647_v61  ;;  %929 = vmatpush1.bf16.msra.mxu0 %v1650_v63  ;;  %v1680_v52 = vld [vmem:[%s2295_s3 + $0x88] ss:$16 sps:$4 sm:$0xff]   ;;  %v1691_v57 = vld [vmem:[%s2295_s3 + $0x24c] ss:$16 sps:$4 sm:$0xff]  }
  0x4a   :  { %905 = vmatprep.subr.bf16.mxu1 %v1655_v0  ;;  %930 = vmatprep.subr.bf16.mxu0 %v1658_v3  ;;  %v1683_v55 = vld [vmem:[%s2295_s3 + $0x268] ss:$16 sps:$4 sm:$0xff]   ;;  %v1694_v58 = vld [vmem:[%s2295_s3 + $0x4c] ss:$16 sps:$4 sm:$0xff]  }
  0x4b   :  { %v1686_v56 = vld [vmem:[%s2295_s3 + $0x68] ss:$16 sps:$4 sm:$0xff]   ;;  %v1697_v61 = vld [vmem:[%s2295_s3 + $0x22c] ss:$16 sps:$4 sm:$0xff]  }
  0x4c   :  { %v1689_v59 = vld [vmem:[%s2295_s3 + $0x248] ss:$16 sps:$4 sm:$0xff]   ;;  %v1700_v62 = vld [vmem:[%s2295_s3 + $0x2c] ss:$16 sps:$4 sm:$0xff]  }
  0x4d   :  { %906 = vmatpush2.bf16.msra.mxu1 %v1653_v1  ;;  %931 = vmatpush1.bf16.msra.mxu0 %v1656_v4  ;;  %v1692_v60 = vld [vmem:[%s2295_s3 + $0x48] ss:$16 sps:$4 sm:$0xff]   ;;  %v1703_v1 = vld [vmem:[%s2295_s3 + $0x20c] ss:$16 sps:$4 sm:$0xff]  }
  0x4e   :  { %998 = vmatprep.subr.bf16.mxu1 %v1661_v5  ;;  %957 = vmatprep.subr.bf16.mxu0 %v1664_v6  ;;  %v1695_v63 = vld [vmem:[%s2295_s3 + $0x228] ss:$16 sps:$4 sm:$0xff]   ;;  %v1706_v3 = vld [vmem:[%s2295_s3 + $0xc] ss:$16 sps:$4 sm:$0xff]  }
  0x4f   :  { %v1698_v0 = vld [vmem:[%s2295_s3 + $0x28] ss:$16 sps:$4 sm:$0xff]   ;;  %v1709_v6 = vld [vmem:[%s2295_s3 + $0x1ec] ss:$16 sps:$4 sm:$0xff]  }
  0x50   :  { %v1701_v4 = vld [vmem:[%s2295_s3 + $0x208] ss:$16 sps:$4 sm:$0xff]   ;;  %v1721_v16 = vld [vmem:[%s2295_s3 + $0x16c] ss:$16 sps:$4 sm:$0xff]  }
  0x51   :  { %v1704_v5 = vld [vmem:[%s2295_s3 + $0x8] ss:$16 sps:$4 sm:$0xff]  }
  0x52   :  { %v1707_v7 = vld [vmem:[%s2295_s3 + $0x1e8] ss:$16 sps:$4 sm:$0xff]  }
  0x53   :  { %v1725_v22 = vld [vmem:[%s2295_s3 + $0x128] ss:$16 sps:$4 sm:$0xff]  }
  0xce   :  { %v181_v8 = vpop.f32.mrf.mxu0 }
  0xcf   :  { %v222_v9 = vpop.f32.mrf.mxu1 }
  0xd0   :  { %v183_v11 = vpop.f32.mrf.mxu0 }
  0xd1   :  { %v224_v12 = vpop.f32.mrf.mxu1 }
  0xd2   :  { %v185_v14 = vpop.f32.mrf.mxu0  ;;  %v270_v20 = vmax.f32 %v181_v8, %v224_v12  ;;  %v1712_v8 = vld [vmem:[%s2295_s3 + $0x1cc] ss:$16 sps:$4 sm:$0xff]   ;;  %v1713_v12 = vld [vmem:[%s2295_s3 + $0x1a8] ss:$16 sps:$4 sm:$0xff]  }
  0xd3   :  { %v226_v15 = vpop.f32.mrf.mxu1  ;;  %v1718_v14 = vld [vmem:[%s2295_s3 + $0x18c] ss:$16 sps:$4 sm:$0xff]  }
  0xd4   :  { %v186_v17 = vpop.f32.mrf.mxu0  ;;  %v290_v24 = vadd.f32 %v278_v21, %v270_v20  ;;  %v1716_v15 = vld [vmem:[%s2295_s3 + $0x188] ss:$16 sps:$4 sm:$0xff]   ;;  %v1727_v21 = vld [vmem:[%s2295_s3 + $0x12c] ss:$16 sps:$4 sm:$0xff]  }
  0xd5   :  { %v227_v18 = vpop.f32.mrf.mxu1  ;;  %v1719_v17 = vld [vmem:[%s2295_s3 + $0x168] ss:$16 sps:$4 sm:$0xff]  }
  0xd6   :  { %v293_v31 = vmax.f32 %v290_v24, 0.0  ;;  %v1724_v18 = vld [vmem:[%s2295_s3 + $0x14c] ss:$16 sps:$4 sm:$0xff]   ;;  %v1722_v20 = vld [vmem:[%s2295_s3 + $0x148] ss:$16 sps:$4 sm:$0xff]  }
  0xd7   :  { %v1728_v24 = vld [vmem:[%s2295_s3 + $0x108] ss:$16 sps:$4 sm:$0xff]  }
  0xd8   :  { %v2060_v39 = vpack.c.bf16 %v293_v31, %v293_v31  ;;  %v1737_v31 = vld [vmem:[%s2297_s5 + $0x60] sm:$0xff]  }
  0xda   :  { %v263_v25 = vpop.f32.mrf.mxu0 }
  0xdb   :  { %v271_v26 = vmax.f32 %v183_v11, %v263_v25  ;;  %v1715_v11 = vld [vmem:[%s2295_s3 + $0x1ac] ss:$16 sps:$4 sm:$0xff]  }
  0xdc   :  { %v265_v28 = vpop.f32.mrf.mxu0  ;;  %v1731_v25 = vld [vmem:[%s2297_s5 + $0x78] sm:$0xff]  }
  0xdd   :  { %v291_v29 = vadd.f32 %v282_v23, %v271_v26  ;;  %v272_v30 = vmax.f32 %v222_v9, %v265_v28  ;;  %v1710_v9 = vld [vmem:[%s2295_s3 + $0x1c8] ss:$16 sps:$4 sm:$0xff]   ;;  %v1730_v23 = vld [vmem:[%s2295_s3 + $0x10c] ss:$16 sps:$4 sm:$0xff]   ;;  %v1734_v28 = vld [vmem:[%s2297_s5 + $0x30] sm:$0xff]  }
  0xde   :  { %v267_v32 = vpop.f32.mrf.mxu0  ;;  %v1732_v26 = vld [vmem:[%s2297_s5 + $0x38] sm:$0xff]  }
  0xdf   :  { %v294_v33 = vmax.f32 %v291_v29, 0.0  ;;  %v292_v34 = vadd.f32 %v286_v27, %v272_v30  ;;  %v1733_v27 = vld [vmem:[%s2297_s5 + $0x70] sm:$0xff]   ;;  %v1735_v29 = vld [vmem:[%s2297_s5 + $0x68] sm:$0xff]   ;;  %v1738_v32 = vld [vmem:[%s2297_s5 + $0x20] sm:$0xff]  }
  0xe0   :  { %v268_v35 = vpop.f32.mrf.mxu0  ;;  %v1736_v30 = vld [vmem:[%s2297_s5 + $0x28] sm:$0xff]  }
  0xe1   :  { %v297_v36 = vpack.c.bf16 %v294_v33, %v294_v33  ;;  %v295_v37 = vmax.f32 %v292_v34, 0.0  ;;  %v1739_v33 = vld [vmem:[%s2297_s5 + $0x58] sm:$0xff]   ;;  %v1741_v35 = vld [vmem:[%s2297_s5 + $0x50] sm:$0xff]  }
  0xe2   :  { %v1740_v34 = vld [vmem:[%s2297_s5 + $0x18] sm:$0xff]  }
  0xe3   :  { %v2065_v41 = vpack.c.bf16 %v295_v37, %v295_v37  ;;  %907 = vmatprep.mubr.bf16.mxu1 %v297_v36  ;;  %v1743_v37 = vld [vmem:[%s2297_s5 + $0x48] sm:$0xff]  }
  0xe4   :  { %908 = vmatmul.mubr.bf16.vlgmr.msra.gmra.mxu1 %v2060_v39 }
  0xe5   :  { %999 = vmatpush1.bf16.msra.mxu1 %v1659_v38  ;;  %949 = vmatmul.mubr.bf16.vlgmr.msra.gmra.mxu0 %v2065_v41  ;;  %v1744_v38 = vld [vmem:[%s2297_s5 + $0x8] sm:$0xff]  }
  0xe6   :  { %958 = vmatpush1.bf16.msra.mxu0 %v1662_v40  ;;  %989 = vmatprep.mubr.bf16.mxu0 %v297_v36  ;;  %v1742_v36 = vld [vmem:[%s2297_s5 + $0x10] sm:$0xff]   ;;  %v1746_v40 = vld [vmem:[%s2297_s5] sm:$0xff]  }
  0xe7   :  { %1000 = vmatprep.subr.bf16.mxu1 %v1667_v42  ;;  %959 = vmatprep.subr.bf16.mxu0 %v1670_v43  ;;  %v1778_v42 = vmov 0.0   ;;  %v1748_v43 = vld [vmem:[%s2299_s7 + $0x30] sm:$0xff]  }
  0xe8   :  { %1030 = vmatprep.mubr.bf16.mxu1 %v1777_v2  ;;  %v1682_v2 = vld [vmem:[%s2295_s3 + $0x8c] ss:$16 sps:$4 sm:$0xff]  }
  0xe9   :  { %1001 = vmatpush1.bf16.msra.mxu1 %v1665_v44  ;;  %v1749_v44 = vld [vmem:[%s2299_s7 + $0x28] sm:$0xff]  }
  0xea   :  { %960 = vmatpush1.bf16.msra.mxu0 %v1668_v45  ;;  %1002 = vmatprep.subr.bf16.mxu1 %v1673_v46  ;;  %v1750_v45 = vld [vmem:[%s2299_s7 + $0x20] sm:$0xff]   ;;  %v1751_v46 = vld [vmem:[%s2299_s7 + $0x18] sm:$0xff]  }
  0xeb   :  { %961 = vmatprep.subr.bf16.mxu0 %v1676_v47 }
  0xed   :  { %1003 = vmatpush1.bf16.msra.mxu1 %v1671_v48 }
  0xee   :  { %962 = vmatpush1.bf16.msra.mxu0 %v1674_v49  ;;  %1004 = vmatprep.subr.bf16.mxu1 %v1679_v50 }
  0xef   :  { %963 = vmatprep.subr.bf16.mxu0 %v1682_v2 }
  0xf1   :  { %1005 = vmatpush1.bf16.msra.mxu1 %v1677_v51 }
  0xf2   :  { %964 = vmatpush1.bf16.msra.mxu0 %v1680_v52  ;;  %1006 = vmatprep.subr.bf16.mxu1 %v1685_v53 }
  0xf3   :  { %965 = vmatprep.subr.bf16.mxu0 %v1688_v54 }
  0xf5   :  { %1007 = vmatpush1.bf16.msra.mxu1 %v1683_v55 }
  0xf6   :  { %966 = vmatpush1.bf16.msra.mxu0 %v1686_v56  ;;  %1008 = vmatprep.subr.bf16.mxu1 %v1691_v57 }
  0xf7   :  { %967 = vmatprep.subr.bf16.mxu0 %v1694_v58 }
  0xf9   :  { %1009 = vmatpush1.bf16.msra.mxu1 %v1689_v59 }
  0xfa   :  { %968 = vmatpush1.bf16.msra.mxu0 %v1692_v60  ;;  %1010 = vmatprep.subr.bf16.mxu1 %v1697_v61  ;;  %v1041_v60 = vld [vmem:[%s2296_s4] sm:$0x3] }
  0xfb   :  { %969 = vmatprep.subr.bf16.mxu0 %v1700_v62 }
  0xfd   :  { %1011 = vmatpush1.bf16.msra.mxu1 %v1695_v63  ;;  %v1046_v63 = vrot.slane %v1041_v60, %v277_v13  ;;  %v1752_v13 = vld [vmem:[%s2299_s7 + $0x10] sm:$0xff]  }
  0xfe   :  { %970 = vmatpush1.bf16.msra.mxu0 %v1698_v0  ;;  %1012 = vmatprep.subr.bf16.mxu1 %v1703_v1 }
  0xff   :  { %971 = vmatprep.subr.bf16.mxu0 %v1706_v3 }
 0x101   :  { %1013 = vmatpush1.bf16.msra.mxu1 %v1701_v4  ;;  %v1050_v4 = vrot.slane %v1041_v60, %v281_v19  ;;  %v1754_v19 = vld [vmem:[%s2299_s7] sm:$0xff]  }
 0x102   :  { %972 = vmatpush1.bf16.msra.mxu0 %v1704_v5  ;;  %1505 = vmatprep.subr.bf16.mxu1 %v1731_v25 }
 0x103   :  { %973 = vmatprep.subr.bf16.mxu0 %v1709_v6 }
 0x104   :  { %1031 = vmatmul.mubr.bf16.vlgmr.msra.gmra.mxu1 %v2065_v41  ;;  %v1747_v41 = vld [vmem:[%s2299_s7 + $0x38] sm:$0xff]   ;;  %s1780_s7 = smov [#allocation2]  }
 0x105   :  { %1506 = vmatpush3.bf16.msra.mxu1 %v1732_v26  ;;  %v1496_v26 = vld [vmem:[%s2300_s8] ss:$0 sm:$0xff]  ;;  %s1354_s12 = sshll.u32 %s1780_s7, 4  ;;  %s1355_s12 = int_to_ptr.vmem [resolvable:$true] %s1354_s12 }
 0x106   :  { %974 = vmatpush2.bf16.msra.mxu0 %v1707_v7  ;;  %1507 = vmatprep.subr.bf16.mxu1 %v1733_v27  ;;  %p1760_p1 = scmp.lt.s32.totalorder %s1355_s12, %s1355_s12 }
 0x107   :  { %975 = vmatprep.subr.bf16.mxu0 %v1712_v8 }
 0x109   :  { %1508 = vmatpush3.bf16.msra.mxu1 %v1734_v28 }
 0x10a   :  { %976 = vmatpush2.bf16.msra.mxu0 %v1710_v9  ;;  %1509 = vmatprep.subr.bf16.mxu1 %v1735_v29 }
 0x10b   :  { %977 = vmatprep.subr.bf16.mxu0 %v1715_v11 }
 0x10d   :  { %1510 = vmatpush3.bf16.msra.mxu1 %v1736_v30 }
 0x10e   :  { %978 = vmatpush2.bf16.msra.mxu0 %v1713_v12  ;;  %1511 = vmatprep.subr.bf16.mxu1 %v1737_v31 }
 0x10f   :  { %979 = vmatprep.subr.bf16.mxu0 %v1718_v14 }
 0x111   :  { %1512 = vmatpush3.bf16.msra.mxu1 %v1738_v32 }
 0x112   :  { %980 = vmatpush2.bf16.msra.mxu0 %v1716_v15  ;;  %1513 = vmatprep.subr.bf16.mxu1 %v1739_v33 }
 0x113   :  { %981 = vmatprep.subr.bf16.mxu0 %v1721_v16 }
 0x115   :  { %1514 = vmatpush3.bf16.msra.mxu1 %v1740_v34 }
 0x116   :  { %982 = vmatpush2.bf16.msra.mxu0 %v1719_v17  ;;  %1515 = vmatprep.subr.bf16.mxu1 %v1741_v35  ;;  %v1479_v17 = vld [vmem:[%s2298_s6] ss:$0 sm:$0xff]  ;;  %s1755_s6 = scalar_lea.vmem %s1355_s12, 32 }
 0x117   :  { %983 = vmatprep.subr.bf16.mxu0 %v1724_v18  ;;  %p1756_p0 = scmp.ne.s32.totalorder %s1355_s12, %s1755_s6  ;;  %p1761_p2 = scmp.lt.s32.totalorder %s1755_s6, %s1755_s6 }
 0x119   :  { %1516 = vmatpush3.bf16.msra.mxu1 %v1742_v36  ;;  %p1762_p3 = por %p1761_p2, %p1760_p1 }
 0x11a   :  { %984 = vmatpush2.bf16.msra.mxu0 %v1722_v20  ;;  %1517 = vmatprep.subr.bf16.mxu1 %v1743_v37 }
 0x11b   :  { %985 = vmatprep.subr.bf16.mxu0 %v1727_v21  ;;  %p1763_p4 = pnand %p1762_p3, %p1756_p0 }
 0x11d   :  { %1518 = vmatpush3.bf16.msra.mxu1 %v1744_v38 }
 0x11e   :  { %986 = vmatpush2.bf16.msra.mxu0 %v1725_v22 }
 0x11f   :  { %987 = vmatprep.subr.bf16.mxu0 %v1730_v23 }
 0x122   :  { %988 = vmatpush2.bf16.msra.mxu0 %v1728_v24 }
 0x123   :  { %1536 = vmatprep.subr.bf16.mxu0 %v1778_v42 }
 0x125   :  { %990 = vmatmul.mubr.bf16.vlgmr.msra.gmra.mxu0 %v2060_v39  ;;  %v1745_v39 = vld [vmem:[%s2297_s5 + $0x40] sm:$0xff]  }
 0x126   :  { %1519 = vmatprep.subr.bf16.mxu1 %v1745_v39  ;;  %1537 = vmatpush3.bf16.msra.mxu0 %v1747_v41 }
 0x127   :  { %1520 = vmatpush3.bf16.msra.mxu1 %v1746_v40  ;;  %1538 = vmatprep.subr.bf16.mxu0 %v1778_v42 }
 0x128   :  { %1552 = vmatprep.mubr.msk.bf16.mxu0 %vm1779_vm1, %v1778_v42 }
 0x12a   :  { %1539 = vmatpush3.bf16.msra.mxu0 %v1748_v43 }
 0x12b   :  { %1540 = vmatprep.subr.bf16.mxu0 %v1778_v42 }
 0x12e   :  { %1541 = vmatpush3.bf16.msra.mxu0 %v1749_v44 }
 0x12f   :  { %1542 = vmatprep.subr.bf16.mxu0 %v1778_v42 }
 0x132   :  { %1543 = vmatpush3.bf16.msra.mxu0 %v1750_v45 }
 0x133   :  { %1544 = vmatprep.subr.bf16.mxu0 %v1778_v42 }
 0x136   :  { %1545 = vmatpush3.bf16.msra.mxu0 %v1751_v46 }
 0x137   :  { %1546 = vmatprep.subr.bf16.mxu0 %v1778_v42 }
 0x13a   :  { %1547 = vmatpush3.bf16.msra.mxu0 %v1752_v13 }
 0x13b   :  { %1548 = vmatprep.subr.bf16.mxu0 %v1778_v42 }
 0x13e   :  { %1549 = vmatpush3.bf16.msra.mxu0 %v1753_v10 }
 0x13f   :  { %1550 = vmatprep.subr.bf16.mxu0 %v1778_v42 }
 0x142   :  { %1551 = vmatpush3.bf16.msra.mxu0 %v1754_v19 }
 0x1a4   :  { %v909_v47 = vpop.f32.mrf.mxu1 }
 0x1a5   :  { %v950_v48 = vpop.f32.mrf.mxu0 }
 0x1a6   :  { %v951_v49 = vadd.f32 %v950_v48, %v909_v47  ;;  %v911_v50 = vpop.f32.mrf.mxu1 }
 0x1a7   :  { %v952_v2 = vpop.f32.mrf.mxu0 }
 0x1a8   :  { %v953_v51 = vadd.f32 %v952_v2, %v911_v50  ;;  %v913_v52 = vpop.f32.mrf.mxu1 }
 0x1a9   :  { %v954_v53 = vpop.f32.mrf.mxu0 }
 0x1aa   :  { %v914_v54 = vpop.f32.mrf.mxu1 }
 0x1ab   :  { %v955_v55 = vpop.f32.mrf.mxu0 }
 0x1c4   :  { %v1032_v56 = vpop.f32.mrf.mxu1 }
 0x1c6   :  { %v1034_v57 = vpop.f32.mrf.mxu1 }
 0x1c8   :  { %v1036_v58 = vpop.f32.mrf.mxu1 }
 0x1ca   :  { %v1037_v59 = vpop.f32.mrf.mxu1 }
 0x1e5   :  { %v991_v61 = vpop.f32.mrf.mxu0 }
 0x1e6   :  { %v1033_v62 = vadd.f32 %v1032_v56, %v991_v61 }
 0x1e7   :  { %v993_v0 = vpop.f32.mrf.mxu0 }
 0x1e8   :  { %v1039_v1 = vmax.f32 %v951_v49, %v1033_v62  ;;  %v1035_v3 = vadd.f32 %v1034_v57, %v993_v0 }
 0x1e9   :  { %v995_v5 = vpop.f32.mrf.mxu0 }
 0x1ea   :  { %v1053_v6 = vadd.f32 %v1046_v63, %v1039_v1  ;;  %v1040_v7 = vmax.f32 %v953_v51, %v1035_v3 }
 0x1eb   :  { %v996_v8 = vpop.f32.mrf.mxu0 }
 0x1ec   :  { %v1054_v9 = vadd.f32 %v1050_v4, %v1040_v7  ;;  %v1055_v11 = vmax.f32 %v1053_v6, 0.0 }
 0x1ee   :  { %v1056_v12 = vmax.f32 %v1054_v9, 0.0  ;;  %v1057_v15 = vpack.c.bf16 %v1055_v11, %v1055_v11 }
 0x1f0   :  { %v1058_v14 = vpack.c.bf16 %v1056_v12, %v1056_v12 }
 0x1f2   :  { %1226 = vmatprep.mubr.bf16.mxu1 %v1058_v14 }
 0x1f3   :  { %1227 = vmatmul.mubr.bf16.vlgmr.msra.gmra.mxu1 %v1057_v15 }
 0x2b3   :  { %v1521_v16 = vpop.f32.mrf.mxu1 }
 0x2b5   :  { %v1522_v18 = vpop.f32.mrf.mxu1 }
 0x2b6   :  { %v1523_v20 = vadd.f32 %v1522_v18, %v1521_v16 }
 0x2b7   :  { %v1524_v21 = vpop.f32.mrf.mxu1 }
 0x2b8   :  { %v1229_v22 = vadd.f32 %v1523_v20, %v1479_v17 }
 0x2b9   :  { %v1525_v23 = vpop.f32.mrf.mxu1 }
 0x2ba   :  { %v1234_v24 = vmax.f32 %v1229_v22, 0.0 }
 0x2bc   :  { %v1235_v25 = vpack.c.bf16 %v1234_v24, %v1234_v24 }
 0x2be   :  { %1553 = vmatmul.mubr.bf16.vlgmr.msra.gmra.mxu0 %v1235_v25 }
 0x37e   :  { %v1341_v27 = vpop.f32.mrf.mxu0 }
 0x37f   :  { %v1342_v28 = vadd.f32 %v1496_v26, %v1341_v27 }
 0x380   :  { %v1554_v29 = vpop.f32.mrf.mxu0 }
 0x381   :  { %1347 = vst [vmem:[#allocation2] sm:$0x3] %v1342_v28 }
 0x382   :  { %v1344_v30 = vpop.f32.mrf.mxu0 }
 0x383   :  { %1766 = shalt.err (!%p1763_p4)
}
 0x384   :  { %1357 = dma.vmem_to_hbm [thread:$0]  %s1355_s12, 32, %s2301_s9, [#allocation3]   ;;  %v1555_v31 = vpop.f32.mrf.mxu0 }
 0x385   :  { %1775 = dma.done.wait [#allocation3], 32  }
 0x386   :  { %1776 = vsyncadd [#allocation3], 4294967264 }
 0x387   :  { %1361 = vsyncpa [#allocation3], 1 }

</bundles_post_ra>
